<compile_context>
chip_gen: v6e
topology: v6e:2x2x1
jax: 0.10.0
libtpu: 0.0.40
codegen_flags: <defaults>
</compile_context>

<pallas_src>
import jax
import jax.numpy as jnp
from jax.experimental import pallas as pl
from jax.experimental.pallas import tpu as pltpu

EPS = 1e-5
PADDED_CLASSES = 128   # lane-dense classifier output width
VEC_WIDTH = 256        # width of the packed per-feature-vector slab

# Row layout of the packed (9, 256) vector slab:
#   0: gamma1  1: beta1   (128 valid lanes)
#   2: gamma2  3: beta2   (256 valid lanes)
#   4: gamma3  5: beta3   (256 valid lanes)
#   6: gamma4  7: beta4   (128 valid lanes)
#   8: classifier bias    (128 valid lanes, zero-padded logits tail)
_LAYER_ROWS = ((0, 1, 128), (2, 3, 256), (4, 5, 256), (6, 7, 128))
_BC_ROW = 8


# ------------------------------ fused kernel ------------------------------- #

def _mlpnet_fused_kernel(x_ref, w1_ref, w2_ref, w3_ref, w4_ref, wc_ref,
                         vec_ref, code_ref, logits_ref):
    def linear_bn_relu(h, w_ref, g_row, be_row, out_dim):
        # Linear (bias dropped: a per-feature constant is a no-op under
        # training-mode BatchNorm).  Weights stored bf16, upcast once; matmul
        # accumulates in f32.
        y = jnp.dot(h, w_ref[...].astype(jnp.float32),
                    preferred_element_type=jnp.float32)
        # BatchNorm1d (training mode, biased variance) folded into an affine.
        mean = jnp.mean(y, axis=0, keepdims=True)
        mean_sq = jnp.mean(y * y, axis=0, keepdims=True)
        var = jnp.maximum(mean_sq - mean * mean, 0.0)       # clamp cancellation
        gamma = vec_ref[g_row:g_row + 1, :out_dim]           # (1, out) f32
        beta = vec_ref[be_row:be_row + 1, :out_dim]
        scale = gamma * jax.lax.rsqrt(var + EPS)
        shift = beta - mean * scale
        # Affine + ReLU.
        return jnp.maximum(y * scale + shift, 0.0)

    h = x_ref[...].astype(jnp.float32)
    h = linear_bn_relu(h, w1_ref, *_LAYER_ROWS[0])
    h = linear_bn_relu(h, w2_ref, *_LAYER_ROWS[1])
    h = linear_bn_relu(h, w3_ref, *_LAYER_ROWS[2])
    h = linear_bn_relu(h, w4_ref, *_LAYER_ROWS[3])

    code_ref[...] = h.astype(code_ref.dtype)

    # Classifier Linear (bias kept), lane-dense: padded to 128 output lanes.
    logits = jnp.dot(h, wc_ref[...].astype(jnp.float32),
                     preferred_element_type=jnp.float32)
    logits = logits + vec_ref[_BC_ROW:_BC_ROW + 1, :PADDED_CLASSES]
    logits_ref[...] = logits.astype(logits_ref.dtype)


# --------------------------------- wrapper ---------------------------------- #

def mlpnet_forward(params, xs):
    """Returns (code, logits) exactly like MLPNet.forward (training-mode BN)."""
    batch = xs.shape[0]
    n_classes = params["n_classes"]
    k_pad = params["k_pad"]

    if xs.shape[1] < k_pad:   # zero-pad features -> lane-dense first matmul LHS
        xs = jnp.pad(xs, ((0, 0), (0, k_pad - xs.shape[1])))

    w1, w2, w3, w4 = params["weights"]          # bf16, (in, out)
    wc = params["wc"]                           # bf16, (128, PADDED_CLASSES)
    vec = params["vec"]                         # f32,  (9, 256) packed slab

    code, logits_padded = pl.pallas_call(
        _mlpnet_fused_kernel,
        out_shape=(
            jax.ShapeDtypeStruct((batch, 128), jnp.float32),
            jax.ShapeDtypeStruct((batch, PADDED_CLASSES), jnp.float32),
        ),
        # Whole network (~0.35 MB bf16 weights + tiny activations) fits in VMEM
        # as a single block on every TPU generation — one launch, 7 input DMAs.
        in_specs=[pl.BlockSpec(memory_space=pltpu.VMEM)] * 7,
        out_specs=(
            pl.BlockSpec(memory_space=pltpu.VMEM),
            pl.BlockSpec(memory_space=pltpu.VMEM),
        ),
    )(xs, w1, w2, w3, w4, wc, vec)

    return code, logits_padded[:, :n_classes]


# ------------------------------ parameter setup ----------------------------- #

def init_mlpnet_params(key, input_size, n_classes):
    """Deterministic synthetic init matching MLPNet's shapes.

    Weights are stored as (in, out) = PyTorch Linear.weight.T, cast to bf16.
    Encoder Linear biases are intentionally omitted (no-op under training-mode
    BatchNorm); BN gamma=1 / beta=0 match nn.BatchNorm1d defaults.
    """
    k_pad = ((input_size + 127) // 128) * 128
    dims = [input_size, 128, 256, 256, 128]

    weights = []
    vec = jnp.zeros((9, VEC_WIDTH), jnp.float32)
    for i in range(4):
        key, kw = jax.random.split(key)
        fan_in, fan_out = dims[i], dims[i + 1]
        bound = 1.0 / jnp.sqrt(fan_in)
        w = jax.random.uniform(kw, (fan_in, fan_out), jnp.float32, -bound, bound)
        if i == 0 and fan_in < k_pad:             # zero-pad K to match padded x
            w = jnp.pad(w, ((0, k_pad - fan_in), (0, 0)))
        weights.append(w.astype(jnp.bfloat16))
        g_row, be_row, _ = _LAYER_ROWS[i]
        vec = vec.at[g_row, :fan_out].set(1.0)    # BN gamma init
        vec = vec.at[be_row, :fan_out].set(0.0)   # BN beta init

    key, kw, kb = jax.random.split(key, 3)
    bound = 1.0 / jnp.sqrt(128.0)
    wc = jax.random.uniform(kw, (128, n_classes), jnp.float32, -bound, bound)
    bc = jax.random.uniform(kb, (n_classes,), jnp.float32, -bound, bound)
    # Zero-pad classifier to 128 output lanes for lane-dense stores.
    wc_pad = jnp.zeros((128, PADDED_CLASSES), jnp.float32).at[:, :n_classes].set(wc)
    vec = vec.at[_BC_ROW, :n_classes].set(bc)

    return {
        "weights": tuple(weights),
        "wc": wc_pad.astype(jnp.bfloat16),
        "vec": vec,
        "n_classes": n_classes,
        "k_pad": k_pad,
    }


# ----------------------------------- main ------------------------------------ #

if __name__ == "__main__":
    input_size = 64
    n_classes = 10
    batch = 8

    key = jax.random.PRNGKey(0)
    key, kx = jax.random.split(key)
    xs = jax.random.normal(kx, (batch, input_size), jnp.float32)

    params = init_mlpnet_params(key, input_size, n_classes)

    code, logits = mlpnet_forward(params, xs)
    jax.block_until_ready((code, logits))

    assert code.shape == (batch, 128)
    assert logits.shape == (batch, n_classes)
    assert bool(jnp.all(jnp.isfinite(code))) and bool(jnp.all(jnp.isfinite(logits)))
    print("KERNEL_OK")
</pallas_src>

<mosaic_0001>
module attributes {stable_mosaic.version = 11 : i64} {
  func.func @_mlpnet_fused_kernel(%arg0: memref<8x128xf32, #tpu.memory_space<vmem>>, %arg1: memref<128x128xbf16, #tpu.memory_space<vmem>>, %arg2: memref<128x256xbf16, #tpu.memory_space<vmem>>, %arg3: memref<256x256xbf16, #tpu.memory_space<vmem>>, %arg4: memref<256x128xbf16, #tpu.memory_space<vmem>>, %arg5: memref<128x128xbf16, #tpu.memory_space<vmem>>, %arg6: memref<9x256xf32, #tpu.memory_space<vmem>>, %arg7: memref<8x128xf32, #tpu.memory_space<vmem>>, %arg8: memref<8x128xf32, #tpu.memory_space<vmem>>) attributes {dimension_semantics = [], scalar_prefetch = 0 : i64, scratch_operands = 0 : i64, tpu.core_type = #tpu.core_type<tc>} {
    %c0 = arith.constant 0 : index
    %c0_0 = arith.constant 0 : index
    %0 = vector.load %arg0[%c0, %c0_0] : memref<8x128xf32, #tpu.memory_space<vmem>>, vector<8x128xf32>
    %c0_1 = arith.constant 0 : index
    %c0_2 = arith.constant 0 : index
    %1 = vector.load %arg1[%c0_1, %c0_2] : memref<128x128xbf16, #tpu.memory_space<vmem>>, vector<128x128xbf16>
    %2 = arith.extf %1 : vector<128x128xbf16> to vector<128x128xf32>
    %cst = arith.constant dense<0.000000e+00> : vector<8x128xf32>
    %3 = tpu.matmul %0, %2, %cst {dimension_numbers = #tpu.dot_dimension_numbers<[1], [0], [0], [1], [0, 0, 1, 1], [], []>} : vector<8x128xf32>, vector<128x128xf32>, vector<8x128xf32> -> vector<8x128xf32>
    %cst_3 = arith.constant dense<0.000000e+00> : vector<128xf32>
    %4 = vector.multi_reduction <add>, %3, %cst_3 [0] : vector<8x128xf32> to vector<128xf32>
    %5 = vector.shape_cast %4 : vector<128xf32> to vector<1x128xf32>
    %cst_4 = arith.constant 8.000000e+00 : f32
    %6 = vector.broadcast %cst_4 : f32 to vector<1x128xf32>
    %7 = arith.divf %5, %6 : vector<1x128xf32>
    %8 = arith.mulf %3, %3 : vector<8x128xf32>
    %cst_5 = arith.constant dense<0.000000e+00> : vector<128xf32>
    %9 = vector.multi_reduction <add>, %8, %cst_5 [0] : vector<8x128xf32> to vector<128xf32>
    %10 = vector.shape_cast %9 : vector<128xf32> to vector<1x128xf32>
    %cst_6 = arith.constant 8.000000e+00 : f32
    %11 = vector.broadcast %cst_6 : f32 to vector<1x128xf32>
    %12 = arith.divf %10, %11 : vector<1x128xf32>
    %13 = arith.mulf %7, %7 : vector<1x128xf32>
    %14 = arith.subf %12, %13 : vector<1x128xf32>
    %cst_7 = arith.constant 0.000000e+00 : f32
    %15 = vector.broadcast %cst_7 : f32 to vector<1x128xf32>
    %16 = arith.maximumf %14, %15 : vector<1x128xf32>
    %c0_8 = arith.constant 0 : index
    %c0_9 = arith.constant 0 : index
    %17 = vector.load %arg6[%c0_8, %c0_9] : memref<9x256xf32, #tpu.memory_space<vmem>>, vector<1x128xf32>
    %c1 = arith.constant 1 : index
    %c0_10 = arith.constant 0 : index
    %18 = vector.load %arg6[%c1, %c0_10] : memref<9x256xf32, #tpu.memory_space<vmem>>, vector<1x128xf32>
    %cst_11 = arith.constant 9.99999974E-6 : f32
    %19 = vector.broadcast %cst_11 : f32 to vector<1x128xf32>
    %20 = arith.addf %16, %19 : vector<1x128xf32>
    %21 = math.rsqrt %20 : vector<1x128xf32>
    %22 = arith.mulf %17, %21 : vector<1x128xf32>
    %23 = arith.mulf %7, %22 : vector<1x128xf32>
    %24 = arith.subf %18, %23 : vector<1x128xf32>
    %25 = vector.broadcast %22 : vector<1x128xf32> to vector<8x128xf32>
    %26 = arith.mulf %3, %25 : vector<8x128xf32>
    %27 = vector.broadcast %24 : vector<1x128xf32> to vector<8x128xf32>
    %28 = arith.addf %26, %27 : vector<8x128xf32>
    %cst_12 = arith.constant 0.000000e+00 : f32
    %29 = vector.broadcast %cst_12 : f32 to vector<8x128xf32>
    %30 = arith.maximumf %28, %29 : vector<8x128xf32>
    %c0_13 = arith.constant 0 : index
    %c0_14 = arith.constant 0 : index
    %31 = vector.load %arg2[%c0_13, %c0_14] : memref<128x256xbf16, #tpu.memory_space<vmem>>, vector<128x256xbf16>
    %32 = arith.extf %31 : vector<128x256xbf16> to vector<128x256xf32>
    %cst_15 = arith.constant dense<0.000000e+00> : vector<8x256xf32>
    %33 = tpu.matmul %30, %32, %cst_15 {dimension_numbers = #tpu.dot_dimension_numbers<[1], [0], [0], [1], [0, 0, 1, 1], [], []>} : vector<8x128xf32>, vector<128x256xf32>, vector<8x256xf32> -> vector<8x256xf32>
    %cst_16 = arith.constant dense<0.000000e+00> : vector<256xf32>
    %34 = vector.multi_reduction <add>, %33, %cst_16 [0] : vector<8x256xf32> to vector<256xf32>
    %35 = vector.shape_cast %34 : vector<256xf32> to vector<1x256xf32>
    %cst_17 = arith.constant 8.000000e+00 : f32
    %36 = vector.broadcast %cst_17 : f32 to vector<1x256xf32>
    %37 = arith.divf %35, %36 : vector<1x256xf32>
    %38 = arith.mulf %33, %33 : vector<8x256xf32>
    %cst_18 = arith.constant dense<0.000000e+00> : vector<256xf32>
    %39 = vector.multi_reduction <add>, %38, %cst_18 [0] : vector<8x256xf32> to vector<256xf32>
    %40 = vector.shape_cast %39 : vector<256xf32> to vector<1x256xf32>
    %cst_19 = arith.constant 8.000000e+00 : f32
    %41 = vector.broadcast %cst_19 : f32 to vector<1x256xf32>
    %42 = arith.divf %40, %41 : vector<1x256xf32>
    %43 = arith.mulf %37, %37 : vector<1x256xf32>
    %44 = arith.subf %42, %43 : vector<1x256xf32>
    %cst_20 = arith.constant 0.000000e+00 : f32
    %45 = vector.broadcast %cst_20 : f32 to vector<1x256xf32>
    %46 = arith.maximumf %44, %45 : vector<1x256xf32>
    %c2 = arith.constant 2 : index
    %c0_21 = arith.constant 0 : index
    %47 = vector.load %arg6[%c2, %c0_21] : memref<9x256xf32, #tpu.memory_space<vmem>>, vector<1x256xf32>
    %c3 = arith.constant 3 : index
    %c0_22 = arith.constant 0 : index
    %48 = vector.load %arg6[%c3, %c0_22] : memref<9x256xf32, #tpu.memory_space<vmem>>, vector<1x256xf32>
    %cst_23 = arith.constant 9.99999974E-6 : f32
    %49 = vector.broadcast %cst_23 : f32 to vector<1x256xf32>
    %50 = arith.addf %46, %49 : vector<1x256xf32>
    %51 = math.rsqrt %50 : vector<1x256xf32>
    %52 = arith.mulf %47, %51 : vector<1x256xf32>
    %53 = arith.mulf %37, %52 : vector<1x256xf32>
    %54 = arith.subf %48, %53 : vector<1x256xf32>
    %55 = vector.broadcast %52 : vector<1x256xf32> to vector<8x256xf32>
    %56 = arith.mulf %33, %55 : vector<8x256xf32>
    %57 = vector.broadcast %54 : vector<1x256xf32> to vector<8x256xf32>
    %58 = arith.addf %56, %57 : vector<8x256xf32>
    %cst_24 = arith.constant 0.000000e+00 : f32
    %59 = vector.broadcast %cst_24 : f32 to vector<8x256xf32>
    %60 = arith.maximumf %58, %59 : vector<8x256xf32>
    %c0_25 = arith.constant 0 : index
    %c0_26 = arith.constant 0 : index
    %61 = vector.load %arg3[%c0_25, %c0_26] : memref<256x256xbf16, #tpu.memory_space<vmem>>, vector<256x256xbf16>
    %62 = arith.extf %61 : vector<256x256xbf16> to vector<256x256xf32>
    %cst_27 = arith.constant dense<0.000000e+00> : vector<8x256xf32>
    %63 = tpu.matmul %60, %62, %cst_27 {dimension_numbers = #tpu.dot_dimension_numbers<[1], [0], [0], [1], [0, 0, 1, 1], [], []>} : vector<8x256xf32>, vector<256x256xf32>, vector<8x256xf32> -> vector<8x256xf32>
    %cst_28 = arith.constant dense<0.000000e+00> : vector<256xf32>
    %64 = vector.multi_reduction <add>, %63, %cst_28 [0] : vector<8x256xf32> to vector<256xf32>
    %65 = vector.shape_cast %64 : vector<256xf32> to vector<1x256xf32>
    %cst_29 = arith.constant 8.000000e+00 : f32
    %66 = vector.broadcast %cst_29 : f32 to vector<1x256xf32>
    %67 = arith.divf %65, %66 : vector<1x256xf32>
    %68 = arith.mulf %63, %63 : vector<8x256xf32>
    %cst_30 = arith.constant dense<0.000000e+00> : vector<256xf32>
    %69 = vector.multi_reduction <add>, %68, %cst_30 [0] : vector<8x256xf32> to vector<256xf32>
    %70 = vector.shape_cast %69 : vector<256xf32> to vector<1x256xf32>
    %cst_31 = arith.constant 8.000000e+00 : f32
    %71 = vector.broadcast %cst_31 : f32 to vector<1x256xf32>
    %72 = arith.divf %70, %71 : vector<1x256xf32>
    %73 = arith.mulf %67, %67 : vector<1x256xf32>
    %74 = arith.subf %72, %73 : vector<1x256xf32>
    %cst_32 = arith.constant 0.000000e+00 : f32
    %75 = vector.broadcast %cst_32 : f32 to vector<1x256xf32>
    %76 = arith.maximumf %74, %75 : vector<1x256xf32>
    %c4 = arith.constant 4 : index
    %c0_33 = arith.constant 0 : index
    %77 = vector.load %arg6[%c4, %c0_33] : memref<9x256xf32, #tpu.memory_space<vmem>>, vector<1x256xf32>
    %c5 = arith.constant 5 : index
    %c0_34 = arith.constant 0 : index
    %78 = vector.load %arg6[%c5, %c0_34] : memref<9x256xf32, #tpu.memory_space<vmem>>, vector<1x256xf32>
    %cst_35 = arith.constant 9.99999974E-6 : f32
    %79 = vector.broadcast %cst_35 : f32 to vector<1x256xf32>
    %80 = arith.addf %76, %79 : vector<1x256xf32>
    %81 = math.rsqrt %80 : vector<1x256xf32>
    %82 = arith.mulf %77, %81 : vector<1x256xf32>
    %83 = arith.mulf %67, %82 : vector<1x256xf32>
    %84 = arith.subf %78, %83 : vector<1x256xf32>
    %85 = vector.broadcast %82 : vector<1x256xf32> to vector<8x256xf32>
    %86 = arith.mulf %63, %85 : vector<8x256xf32>
    %87 = vector.broadcast %84 : vector<1x256xf32> to vector<8x256xf32>
    %88 = arith.addf %86, %87 : vector<8x256xf32>
    %cst_36 = arith.constant 0.000000e+00 : f32
    %89 = vector.broadcast %cst_36 : f32 to vector<8x256xf32>
    %90 = arith.maximumf %88, %89 : vector<8x256xf32>
    %c0_37 = arith.constant 0 : index
    %c0_38 = arith.constant 0 : index
    %91 = vector.load %arg4[%c0_37, %c0_38] : memref<256x128xbf16, #tpu.memory_space<vmem>>, vector<256x128xbf16>
    %92 = arith.extf %91 : vector<256x128xbf16> to vector<256x128xf32>
    %cst_39 = arith.constant dense<0.000000e+00> : vector<8x128xf32>
    %93 = tpu.matmul %90, %92, %cst_39 {dimension_numbers = #tpu.dot_dimension_numbers<[1], [0], [0], [1], [0, 0, 1, 1], [], []>} : vector<8x256xf32>, vector<256x128xf32>, vector<8x128xf32> -> vector<8x128xf32>
    %cst_40 = arith.constant dense<0.000000e+00> : vector<128xf32>
    %94 = vector.multi_reduction <add>, %93, %cst_40 [0] : vector<8x128xf32> to vector<128xf32>
    %95 = vector.shape_cast %94 : vector<128xf32> to vector<1x128xf32>
    %cst_41 = arith.constant 8.000000e+00 : f32
    %96 = vector.broadcast %cst_41 : f32 to vector<1x128xf32>
    %97 = arith.divf %95, %96 : vector<1x128xf32>
    %98 = arith.mulf %93, %93 : vector<8x128xf32>
    %cst_42 = arith.constant dense<0.000000e+00> : vector<128xf32>
    %99 = vector.multi_reduction <add>, %98, %cst_42 [0] : vector<8x128xf32> to vector<128xf32>
    %100 = vector.shape_cast %99 : vector<128xf32> to vector<1x128xf32>
    %cst_43 = arith.constant 8.000000e+00 : f32
    %101 = vector.broadcast %cst_43 : f32 to vector<1x128xf32>
    %102 = arith.divf %100, %101 : vector<1x128xf32>
    %103 = arith.mulf %97, %97 : vector<1x128xf32>
    %104 = arith.subf %102, %103 : vector<1x128xf32>
    %cst_44 = arith.constant 0.000000e+00 : f32
    %105 = vector.broadcast %cst_44 : f32 to vector<1x128xf32>
    %106 = arith.maximumf %104, %105 : vector<1x128xf32>
    %c6 = arith.constant 6 : index
    %c0_45 = arith.constant 0 : index
    %107 = vector.load %arg6[%c6, %c0_45] : memref<9x256xf32, #tpu.memory_space<vmem>>, vector<1x128xf32>
    %c7 = arith.constant 7 : index
    %c0_46 = arith.constant 0 : index
    %108 = vector.load %arg6[%c7, %c0_46] : memref<9x256xf32, #tpu.memory_space<vmem>>, vector<1x128xf32>
    %cst_47 = arith.constant 9.99999974E-6 : f32
    %109 = vector.broadcast %cst_47 : f32 to vector<1x128xf32>
    %110 = arith.addf %106, %109 : vector<1x128xf32>
    %111 = math.rsqrt %110 : vector<1x128xf32>
    %112 = arith.mulf %107, %111 : vector<1x128xf32>
    %113 = arith.mulf %97, %112 : vector<1x128xf32>
    %114 = arith.subf %108, %113 : vector<1x128xf32>
    %115 = vector.broadcast %112 : vector<1x128xf32> to vector<8x128xf32>
    %116 = arith.mulf %93, %115 : vector<8x128xf32>
    %117 = vector.broadcast %114 : vector<1x128xf32> to vector<8x128xf32>
    %118 = arith.addf %116, %117 : vector<8x128xf32>
    %cst_48 = arith.constant 0.000000e+00 : f32
    %119 = vector.broadcast %cst_48 : f32 to vector<8x128xf32>
    %120 = arith.maximumf %118, %119 : vector<8x128xf32>
    %c0_49 = arith.constant 0 : index
    %c0_50 = arith.constant 0 : index
    %121 = vector.load %arg7[%c0_49, %c0_50] : memref<8x128xf32, #tpu.memory_space<vmem>>, vector<8x128xf32>
    tpu.vector_store %arg7[%c0_49, %c0_50], %120 {strides = array<i32>} : memref<8x128xf32, #tpu.memory_space<vmem>>, vector<8x128xf32>,
    %c0_51 = arith.constant 0 : index
    %c0_52 = arith.constant 0 : index
    %122 = vector.load %arg5[%c0_51, %c0_52] : memref<128x128xbf16, #tpu.memory_space<vmem>>, vector<128x128xbf16>
    %123 = arith.extf %122 : vector<128x128xbf16> to vector<128x128xf32>
    %cst_53 = arith.constant dense<0.000000e+00> : vector<8x128xf32>
    %124 = tpu.matmul %120, %123, %cst_53 {dimension_numbers = #tpu.dot_dimension_numbers<[1], [0], [0], [1], [0, 0, 1, 1], [], []>} : vector<8x128xf32>, vector<128x128xf32>, vector<8x128xf32> -> vector<8x128xf32>
    %c8 = arith.constant 8 : index
    %c0_54 = arith.constant 0 : index
    %125 = vector.load %arg6[%c8, %c0_54] : memref<9x256xf32, #tpu.memory_space<vmem>>, vector<1x128xf32>
    %126 = vector.broadcast %125 : vector<1x128xf32> to vector<8x128xf32>
    %127 = arith.addf %124, %126 : vector<8x128xf32>
    %c0_55 = arith.constant 0 : index
    %c0_56 = arith.constant 0 : index
    %128 = vector.load %arg8[%c0_55, %c0_56] : memref<8x128xf32, #tpu.memory_space<vmem>>, vector<8x128xf32>
    tpu.vector_store %arg8[%c0_55, %c0_56], %127 {strides = array<i32>} : memref<8x128xf32, #tpu.memory_space<vmem>>, vector<8x128xf32>,
    return
  }
}

</mosaic_0001>

<bundles_post_ra>
// kernel: tpu_custom_call.1
= control target key start
LH: loop header
LB: loop body
LE: loop exit
PB: predicated region body
PF: predicated region fallthrough
CT: control target
= control target key end

     0   :  { %14 = vsyncpa [#allocation3], 0  ;;  %s1760_s0 = inlined_call_operand.hbm [shape: f32[8,128], index: 0, kind: input, shape index: {}]   ;;  %s1761_s1 = inlined_call_operand.hbm [shape: bf16[128,128], index: 1, kind: input, shape index: {}]   ;;  %s1762_s2 = inlined_call_operand.hbm [shape: bf16[128,256], index: 2, kind: input, shape index: {}]   ;;  %s1763_s3 = inlined_call_operand.hbm [shape: bf16[256,256], index: 3, kind: input, shape index: {}]   ;;  %s1764_s4 = inlined_call_operand.hbm [shape: bf16[256,128], index: 4, kind: input, shape index: {}]   ;;  %s1765_s5 = inlined_call_operand.hbm [shape: bf16[128,128], index: 5, kind: input, shape index: {}]   ;;  %s1766_s6 = inlined_call_operand.hbm [shape: f32[9,256], index: 6, kind: input, shape index: {}]   ;;  %s1767_s7 = inlined_call_operand.hbm [shape: f32[8,128], index: 7, kind: output, shape index: {0}]   ;;  %s1768_s8 = inlined_call_operand.hbm [shape: f32[8,128], index: 8, kind: output, shape index: {1}]  }
   0x1   :  { %15 = vsyncpa [#allocation6], 0 }
   0x2   :  { %16 = vsyncpa [#allocation9], 0 }
   0x3   :  { %17 = vsyncpa [#allocation12], 0 }
   0x4   :  { %18 = vsyncpa [#allocation4], 0 }
   0x5   :  { %19 = vsyncpa [#allocation16], 0  ;;  %s1582_s27 = smov [#allocation5]  }
   0x6   :  { %s35_s28 = sshll.u32 %s1582_s27, 4  ;;  %s36_s28 = int_to_ptr.vmem [resolvable:$true] %s35_s28 }
   0x7   :  { %s1398_s29 = scalar_lea.vmem %s36_s28, 1024  ;;  %p1403_p1 = scmp.lt.s32.totalorder %s36_s28, %s36_s28 }
   0x8   :  { %p1399_p0 = scmp.ne.s32.totalorder %s36_s28, %s1398_s29  ;;  %p1404_p2 = scmp.lt.s32.totalorder %s1398_s29, %s1398_s29 }
   0xa   :  { %p1405_p3 = por %p1404_p2, %p1403_p1 }
   0xc   :  { %p1406_p4 = pnand %p1405_p3, %p1399_p0 }
   0xe   :  { %1409 = shalt.err (!%p1406_p4)
}
   0xf   :  { %s1583_s30 = smov 64   ;;  %s1584_s9 = smov 4  }
  0x10   :  { %41 = dma.hbm_to_vmem [thread:$0]  %s1761_s1, 1024, %s36_s28, [#allocation6], %s1583_s30, %s1583_s30, %s1584_s9  }
  0x11   :  { %s1585_s12 = smov [#allocation8]   ;;  %s1586_s14 = smov [#allocation11]  }
  0x12   :  { %s59_s13 = sshll.u32 %s1585_s12, 4  ;;  %s83_s15 = sshll.u32 %s1586_s14, 4  ;;  %s60_s13 = int_to_ptr.vmem [resolvable:$true] %s59_s13  ;;  %s84_s15 = int_to_ptr.vmem [resolvable:$true] %s83_s15 }
  0x13   :  { %s1418_s16 = scalar_lea.vmem %s60_s13, 4096  ;;  %p1423_p6 = scmp.lt.s32.totalorder %s60_s13, %s60_s13 }
  0x14   :  { %p1419_p5 = scmp.ne.s32.totalorder %s60_s13, %s1418_s16  ;;  %p1424_p7 = scmp.lt.s32.totalorder %s1418_s16, %s1418_s16 }
  0x16   :  { %p1425_p8 = por %p1424_p7, %p1423_p6 }
  0x18   :  { %p1426_p9 = pnand %p1425_p8, %p1419_p5 }
  0x1a   :  { %1429 = shalt.err (!%p1426_p9)
}
  0x1b   :  { %s1587_s17 = smov 128   ;;  %s1588_s18 = smov 8  }
  0x1c   :  { %65 = dma.hbm_to_vmem [thread:$0]  %s1763_s3, 4096, %s60_s13, [#allocation9], %s1587_s17, %s1587_s17, %s1588_s18  }
  0x1d   :  { %s1438_s1 = scalar_lea.vmem %s84_s15, 1024  ;;  %p1443_p11 = scmp.lt.s32.totalorder %s84_s15, %s84_s15 }
  0x1e   :  { %p1439_p10 = scmp.ne.s32.totalorder %s84_s15, %s1438_s1  ;;  %p1444_p12 = scmp.lt.s32.totalorder %s1438_s1, %s1438_s1 }
  0x20   :  { %p1445_p13 = por %p1444_p12, %p1443_p11 }
  0x22   :  { %p1446_p0 = pnand %p1445_p13, %p1439_p10 }
  0x24   :  { %1449 = shalt.err (!%p1446_p0)
}
  0x25   :  { %89 = dma.hbm_to_vmem [thread:$0]  %s1765_s5, 1024, %s84_s15, [#allocation12], %s1583_s30, %s1583_s30, %s1584_s9  }
  0x26   :  { %s1589_s23 = smov [#allocation2]   ;;  %s1590_s25 = smov [#allocation7]  }
  0x27   :  { %s26_s24 = sshll.u32 %s1589_s23, 4  ;;  %s47_s3 = sshll.u32 %s1590_s25, 4  ;;  %s27_s24 = int_to_ptr.vmem [resolvable:$true] %s26_s24  ;;  %s48_s3 = int_to_ptr.vmem [resolvable:$true] %s47_s3 }
  0x28   :  { %s1458_s26 = scalar_lea.vmem %s27_s24, 128  ;;  %p1463_p2 = scmp.lt.s32.totalorder %s27_s24, %s27_s24 }
  0x29   :  { %p1459_p1 = scmp.ne.s32.totalorder %s27_s24, %s1458_s26  ;;  %p1464_p3 = scmp.lt.s32.totalorder %s1458_s26, %s1458_s26 }
  0x2b   :  { %p1465_p4 = por %p1464_p3, %p1463_p2 }
  0x2d   :  { %p1466_p5 = pnand %p1465_p4, %p1459_p1 }
  0x2f   :  { %1469 = shalt.err (!%p1466_p5)
}
  0x30   :  { %29 = dma.hbm_to_vmem [thread:$0]  %s1760_s0, 128, %s27_s24, [#allocation3]  }
  0x31   :  { %s1478_s29 = scalar_lea.vmem %s48_s3, 2048  ;;  %p1483_p7 = scmp.lt.s32.totalorder %s48_s3, %s48_s3 }
  0x32   :  { %p1479_p6 = scmp.ne.s32.totalorder %s48_s3, %s1478_s29  ;;  %p1484_p8 = scmp.lt.s32.totalorder %s1478_s29, %s1478_s29 }
  0x34   :  { %p1485_p9 = por %p1484_p8, %p1483_p7 }
  0x36   :  { %p1486_p10 = pnand %p1485_p9, %p1479_p6 }
  0x38   :  { %1489 = shalt.err (!%p1486_p10)
}
  0x39   :  { %53 = dma.hbm_to_vmem [thread:$0]  %s1762_s2, 2048, %s48_s3, [#allocation6], %s1587_s17, %s1587_s17, %s1588_s18  }
  0x3a   :  { %s1591_s11 = smov [#allocation10]   ;;  %s1592_s13 = smov [#allocation13]  }
  0x3b   :  { %s71_s12 = sshll.u32 %s1591_s11, 4  ;;  %s95_s0 = sshll.u32 %s1592_s13, 4  ;;  %s72_s12 = int_to_ptr.vmem [resolvable:$true] %s71_s12  ;;  %s96_s0 = int_to_ptr.vmem [resolvable:$true] %s95_s0 }
  0x3c   :  { %s1498_s14 = scalar_lea.vmem %s72_s12, 2048  ;;  %p1503_p12 = scmp.lt.s32.totalorder %s72_s12, %s72_s12 }
  0x3d   :  { %p1499_p11 = scmp.ne.s32.totalorder %s72_s12, %s1498_s14  ;;  %p1504_p13 = scmp.lt.s32.totalorder %s1498_s14, %s1498_s14 }
  0x3f   :  { %p1505_p0 = por %p1504_p13, %p1503_p12 }
  0x41   :  { %p1506_p1 = pnand %p1505_p0, %p1499_p11 }
  0x43   :  { %1509 = shalt.err (!%p1506_p1)
}
  0x44   :  { %77 = dma.hbm_to_vmem [thread:$0]  %s1764_s4, 2048, %s72_s12, [#allocation9], %s1583_s30, %s1583_s30, %s1584_s9  }
  0x45   :  { %s1518_s2 = scalar_lea.vmem %s96_s0, 512  ;;  %p1523_p3 = scmp.lt.s32.totalorder %s96_s0, %s96_s0 }
  0x46   :  { %p1519_p2 = scmp.ne.s32.totalorder %s96_s0, %s1518_s2  ;;  %p1524_p4 = scmp.lt.s32.totalorder %s1518_s2, %s1518_s2 }
  0x48   :  { %p1525_p5 = por %p1524_p4, %p1523_p3 }
  0x4a   :  { %p1526_p6 = pnand %p1525_p5, %p1519_p2 }
  0x4c   :  { %1529 = shalt.err (!%p1526_p6)
}
  0x4d   :  { %s1593_s17 = smov 256   ;;  %s1594_s18 = smov 16  }
  0x4e   :  { %101 = dma.hbm_to_vmem [thread:$0]  %s1766_s6, 512, %s96_s0, [#allocation12], %s1593_s17, %s1593_s17, %s1594_s18  }
  0x4f   :  { %1570 = dma.done.wait [#allocation3], 128  }
  0x50   :  { %1571 = vsyncadd [#allocation3], 4294967168 }
  0x51   :  { %1572 = dma.done.wait [#allocation6], 3072  }
  0x52   :  { %1573 = vsyncadd [#allocation6], 4294964224 }
  0x53   :  { %1574 = dma.done.wait [#allocation9], 6144  }
  0x54   :  { %1575 = vsyncadd [#allocation9], 4294961152 }
  0x55   :  { %1576 = dma.done.wait [#allocation12], 1536  }
  0x56   :  { %1577 = vsyncadd [#allocation12], 4294965760  ;;  %v1595_v0 = vmov 0.0   ;;  %vm1596_vm0 = vmmov 0   ;;  %v1198_v1 = vld [vmem:[#allocation5 + $0x38] sm:$0xff]   ;;  %v1197_v2 = vld [vmem:[#allocation5 + $0x30] sm:$0xff]  }
  0x57   :  { %1290 = vmatprep.subr.mxu0 %v1595_v0  ;;  %1322 = vmatprep.mubr.msk.f32.mxu0 %vm1596_vm0, %v1595_v0  ;;  %v1094_v3 = vunpack.c.l.bf16 %v1198_v1  ;;  %v1095_v4 = vunpack.c.h.bf16 %v1198_v1  ;;  %v1091_v5 = vunpack.c.h.bf16 %v1197_v2  ;;  %v1196_v6 = vld [vmem:[#allocation5 + $0x28] sm:$0xff]   ;;  %v1090_v7 = vunpack.c.l.bf16 %v1197_v2  ;;  %v1195_v9 = vld [vmem:[#allocation5 + $0x20] sm:$0xff]   ;;  %v1194_v12 = vld [vmem:[#allocation5 + $0x18] sm:$0xff]   ;;  %s1598_s4 = smov [#allocation14]  }
  0x58   :  { %367 = vmatprep.mubr.f32.mxu1 %v1595_v0  ;;  %v1087_v8 = vunpack.c.h.bf16 %v1196_v6  ;;  %v1086_v10 = vunpack.c.l.bf16 %v1196_v6  ;;  %v1083_v11 = vunpack.c.h.bf16 %v1195_v9  ;;  %v1082_v13 = vunpack.c.l.bf16 %v1195_v9  ;;  %v1193_v15 = vld [vmem:[#allocation5 + $0x10] sm:$0xff]   ;;  %v1192_v18 = vld [vmem:[#allocation5 + $0x8] sm:$0xff]   ;;  %v1065_v21 = vld [vmem:[#allocation5] sm:$0xff]   ;;  %s1038_s6 = sshll.u32 %s1598_s4, 4  ;;  %s1039_s6 = int_to_ptr.vmem [resolvable:$true] %s1038_s6 }
  0x59   :  { %1291 = vmatpush3.msra.mxu0 %v1095_v4  ;;  %v1079_v14 = vunpack.c.h.bf16 %v1194_v12  ;;  %v1078_v16 = vunpack.c.l.bf16 %v1194_v12  ;;  %v1075_v17 = vunpack.c.h.bf16 %v1193_v15  ;;  %v1074_v19 = vunpack.c.l.bf16 %v1193_v15  ;;  %v123_v25 = vld [vmem:[#allocation2] sm:$0xff]  ;;  %v269_v29 = vld [vmem:[#allocation7 + $0x70] sm:$0xff]  ;;  %v268_v32 = vld [vmem:[#allocation7 + $0x68] sm:$0xff]  ;;  %s1530_s30 = scalar_lea.vmem %s1039_s6, 128  ;;  %p1535_p8 = scmp.lt.s32.totalorder %s1039_s6, %s1039_s6 }
  0x5a   :  { %1292 = vmatprep.subr.mxu0 %v1595_v0  ;;  %v1071_v20 = vunpack.c.h.bf16 %v1192_v18  ;;  %v1070_v22 = vunpack.c.l.bf16 %v1192_v18  ;;  %v1067_v23 = vunpack.c.h.bf16 %v1065_v21  ;;  %v1066_v24 = vunpack.c.l.bf16 %v1065_v21  ;;  %v270_v26 = vld [vmem:[#allocation7 + $0x78] sm:$0xff]  ;;  %v267_v35 = vld [vmem:[#allocation7 + $0x60] sm:$0xff]  ;;  %v265_v41 = vld [vmem:[#allocation7 + $0x50] sm:$0xff]  ;;  %p1531_p7 = scmp.ne.s32.totalorder %s1039_s6, %s1530_s30  ;;  %p1536_p9 = scmp.lt.s32.totalorder %s1530_s30, %s1530_s30 }
  0x5b   :  { %1293 = vmatpush3.msra.mxu0 %v1094_v3  ;;  %v302_v27 = vunpack.c.h.bf16 %v270_v26  ;;  %v301_v28 = vunpack.c.l.bf16 %v270_v26  ;;  %v300_v30 = vunpack.c.h.bf16 %v269_v29  ;;  %v299_v31 = vunpack.c.l.bf16 %v269_v29  ;;  %v266_v38 = vld [vmem:[#allocation7 + $0x58] sm:$0xff]  ;;  %v264_v44 = vld [vmem:[#allocation7 + $0x48] sm:$0xff]  ;;  %v263_v47 = vld [vmem:[#allocation7 + $0x40] sm:$0xff] }
  0x5c   :  { %1294 = vmatprep.subr.mxu0 %v1595_v0  ;;  %v298_v33 = vunpack.c.h.bf16 %v268_v32  ;;  %v297_v34 = vunpack.c.l.bf16 %v268_v32  ;;  %v296_v36 = vunpack.c.h.bf16 %v267_v35  ;;  %v295_v37 = vunpack.c.l.bf16 %v267_v35  ;;  %v262_v50 = vld [vmem:[#allocation7 + $0x38] sm:$0xff]  ;;  %v261_v53 = vld [vmem:[#allocation7 + $0x30] sm:$0xff]  ;;  %v260_v56 = vld [vmem:[#allocation7 + $0x28] sm:$0xff]  ;;  %p1537_p10 = por %p1536_p9, %p1535_p8 }
  0x5d   :  { %1295 = vmatpush3.msra.mxu0 %v1091_v5  ;;  %303 = vmatprep.subr.mxu1 %v302_v27  ;;  %v294_v39 = vunpack.c.h.bf16 %v266_v38  ;;  %v293_v40 = vunpack.c.l.bf16 %v266_v38  ;;  %v292_v42 = vunpack.c.h.bf16 %v265_v41  ;;  %v291_v43 = vunpack.c.l.bf16 %v265_v41  ;;  %v259_v59 = vld [vmem:[#allocation7 + $0x20] sm:$0xff]  ;;  %v258_v62 = vld [vmem:[#allocation7 + $0x18] sm:$0xff]  ;;  %v257_v2 = vld [vmem:[#allocation7 + $0x10] sm:$0xff] }
  0x5e   :  { %1296 = vmatprep.subr.mxu0 %v1595_v0  ;;  %304 = vmatpush1.msra.mxu1 %v301_v28  ;;  %v290_v45 = vunpack.c.h.bf16 %v264_v44  ;;  %v289_v46 = vunpack.c.l.bf16 %v264_v44  ;;  %v288_v48 = vunpack.c.h.bf16 %v263_v47  ;;  %v287_v49 = vunpack.c.l.bf16 %v263_v47  ;;  %v256_v5 = vld [vmem:[#allocation7 + $0x8] sm:$0xff]  ;;  %v255_v6 = vld [vmem:[#allocation7] sm:$0xff]  ;;  %v501_v41 = vld [vmem:[#allocation8 + $0x78] sm:$0xff]  ;;  %p1538_p11 = pnand %p1537_p10, %p1531_p7 }
  0x5f   :  { %1297 = vmatpush3.msra.mxu0 %v1090_v7  ;;  %305 = vmatprep.subr.mxu1 %v300_v30  ;;  %v286_v51 = vunpack.c.h.bf16 %v262_v50  ;;  %v285_v52 = vunpack.c.l.bf16 %v262_v50  ;;  %v284_v54 = vunpack.c.h.bf16 %v261_v53  ;;  %v283_v55 = vunpack.c.l.bf16 %v261_v53  ;;  %v245_v32 = vld [vmem:[#allocation13] ss:$0 sm:$0xff]  ;;  %v246_v35 = vld [vmem:[#allocation13 + $0x1] ss:$0 sm:$0xff]  ;;  %v500_v44 = vld [vmem:[#allocation8 + $0x70] sm:$0xff] }
  0x60   :  { %1298 = vmatprep.subr.mxu0 %v1595_v0  ;;  %306 = vmatpush1.msra.mxu1 %v299_v31  ;;  %v282_v57 = vunpack.c.h.bf16 %v260_v56  ;;  %v281_v58 = vunpack.c.l.bf16 %v260_v56  ;;  %v280_v60 = vunpack.c.h.bf16 %v259_v59  ;;  %v279_v61 = vunpack.c.l.bf16 %v259_v59  ;;  %v499_v47 = vld [vmem:[#allocation8 + $0x68] sm:$0xff]  ;;  %v498_v50 = vld [vmem:[#allocation8 + $0x60] sm:$0xff]  ;;  %v497_v53 = vld [vmem:[#allocation8 + $0x58] sm:$0xff] }
  0x61   :  { %1299 = vmatpush3.msra.mxu0 %v1087_v8  ;;  %307 = vmatprep.subr.mxu1 %v298_v33  ;;  %v278_v63 = vunpack.c.h.bf16 %v258_v62  ;;  %v277_v1 = vunpack.c.l.bf16 %v258_v62  ;;  %v276_v3 = vunpack.c.h.bf16 %v257_v2  ;;  %v275_v4 = vunpack.c.l.bf16 %v257_v2  ;;  %v496_v56 = vld [vmem:[#allocation8 + $0x50] sm:$0xff]  ;;  %v495_v59 = vld [vmem:[#allocation8 + $0x48] sm:$0xff]  ;;  %v494_v62 = vld [vmem:[#allocation8 + $0x40] sm:$0xff] }
  0x62   :  { %1300 = vmatprep.subr.mxu0 %v1595_v0  ;;  %308 = vmatpush1.msra.mxu1 %v297_v34  ;;  %v274_v7 = vunpack.c.h.bf16 %v256_v5  ;;  %v273_v8 = vunpack.c.l.bf16 %v256_v5  ;;  %v272_v9 = vunpack.c.h.bf16 %v255_v6  ;;  %v493_v2 = vld [vmem:[#allocation8 + $0x38] sm:$0xff]  ;;  %v492_v5 = vld [vmem:[#allocation8 + $0x30] sm:$0xff] }
  0x63   :  { %1301 = vmatpush3.msra.mxu0 %v1086_v10  ;;  %309 = vmatprep.subr.mxu1 %v296_v36  ;;  %v271_v10 = vunpack.c.l.bf16 %v255_v6  ;;  %v531_v6 = vunpack.c.h.bf16 %v492_v5 }
  0x64   :  { %1302 = vmatprep.subr.mxu0 %v1595_v0  ;;  %310 = vmatpush1.msra.mxu1 %v295_v37 }
  0x65   :  { %1303 = vmatpush3.msra.mxu0 %v1083_v11  ;;  %311 = vmatprep.subr.mxu1 %v294_v39 }
  0x66   :  { %1304 = vmatprep.subr.mxu0 %v1595_v0  ;;  %312 = vmatpush1.msra.mxu1 %v293_v40 }
  0x67   :  { %1305 = vmatpush3.msra.mxu0 %v1082_v13  ;;  %313 = vmatprep.subr.mxu1 %v292_v42  ;;  %v549_v42 = vunpack.c.h.bf16 %v501_v41 }
  0x68   :  { %1306 = vmatprep.subr.mxu0 %v1595_v0  ;;  %314 = vmatpush1.msra.mxu1 %v291_v43  ;;  %v548_v43 = vunpack.c.l.bf16 %v501_v41  ;;  %v512_v41 = vld [vmem:[#allocation8 + $0xd0] sm:$0xff] }
  0x69   :  { %1307 = vmatpush3.msra.mxu0 %v1079_v14  ;;  %315 = vmatprep.subr.mxu1 %v290_v45  ;;  %v547_v45 = vunpack.c.h.bf16 %v500_v44 }
  0x6a   :  { %1308 = vmatprep.subr.mxu0 %v1595_v0  ;;  %316 = vmatpush1.msra.mxu1 %v289_v46  ;;  %v546_v46 = vunpack.c.l.bf16 %v500_v44  ;;  %v511_v44 = vld [vmem:[#allocation8 + $0xc8] sm:$0xff] }
  0x6b   :  { %1309 = vmatpush3.msra.mxu0 %v1078_v16  ;;  %317 = vmatprep.subr.mxu1 %v288_v48  ;;  %v545_v48 = vunpack.c.h.bf16 %v499_v47 }
  0x6c   :  { %1310 = vmatprep.subr.mxu0 %v1595_v0  ;;  %318 = vmatpush1.msra.mxu1 %v287_v49  ;;  %v544_v49 = vunpack.c.l.bf16 %v499_v47  ;;  %v510_v47 = vld [vmem:[#allocation8 + $0xc0] sm:$0xff] }
  0x6d   :  { %1311 = vmatpush3.msra.mxu0 %v1075_v17  ;;  %319 = vmatprep.subr.mxu1 %v286_v51  ;;  %v543_v51 = vunpack.c.h.bf16 %v498_v50 }
  0x6e   :  { %1312 = vmatprep.subr.mxu0 %v1595_v0  ;;  %320 = vmatpush1.msra.mxu1 %v285_v52  ;;  %v542_v52 = vunpack.c.l.bf16 %v498_v50  ;;  %v509_v50 = vld [vmem:[#allocation8 + $0xb8] sm:$0xff] }
  0x6f   :  { %1313 = vmatpush3.msra.mxu0 %v1074_v19  ;;  %321 = vmatprep.subr.mxu1 %v284_v54  ;;  %v541_v54 = vunpack.c.h.bf16 %v497_v53 }
  0x70   :  { %1314 = vmatprep.subr.mxu0 %v1595_v0  ;;  %322 = vmatpush1.msra.mxu1 %v283_v55  ;;  %v540_v55 = vunpack.c.l.bf16 %v497_v53  ;;  %v508_v53 = vld [vmem:[#allocation8 + $0xb0] sm:$0xff] }
  0x71   :  { %1315 = vmatpush3.msra.mxu0 %v1071_v20  ;;  %323 = vmatprep.subr.mxu1 %v282_v57  ;;  %v539_v57 = vunpack.c.h.bf16 %v496_v56 }
  0x72   :  { %1316 = vmatprep.subr.mxu0 %v1595_v0  ;;  %324 = vmatpush1.msra.mxu1 %v281_v58  ;;  %v538_v58 = vunpack.c.l.bf16 %v496_v56  ;;  %v507_v56 = vld [vmem:[#allocation8 + $0xa8] sm:$0xff] }
  0x73   :  { %1317 = vmatpush3.msra.mxu0 %v1070_v22  ;;  %325 = vmatprep.subr.mxu1 %v280_v60  ;;  %v537_v60 = vunpack.c.h.bf16 %v495_v59 }
  0x74   :  { %1318 = vmatprep.subr.mxu0 %v1595_v0  ;;  %326 = vmatpush1.msra.mxu1 %v279_v61  ;;  %v536_v61 = vunpack.c.l.bf16 %v495_v59  ;;  %v560_v59 = vunpack.c.l.bf16 %v507_v56 }
  0x75   :  { %1319 = vmatpush3.msra.mxu0 %v1067_v23  ;;  %327 = vmatprep.subr.mxu1 %v278_v63  ;;  %v535_v63 = vunpack.c.h.bf16 %v494_v62 }
  0x76   :  { %1320 = vmatprep.subr.mxu0 %v1595_v0  ;;  %328 = vmatpush1.msra.mxu1 %v277_v1  ;;  %v534_v1 = vunpack.c.l.bf16 %v494_v62 }
  0x77   :  { %1321 = vmatpush3.msra.mxu0 %v1066_v24  ;;  %329 = vmatprep.subr.mxu1 %v276_v3  ;;  %v533_v3 = vunpack.c.h.bf16 %v493_v2 }
  0x78   :  { %1323 = vmatmul.mubr.f32.vlgmr.msra.gmra.mxu0 %v123_v25  ;;  %330 = vmatpush1.msra.mxu1 %v275_v4  ;;  %v532_v4 = vunpack.c.l.bf16 %v493_v2 }
  0x79   :  { %331 = vmatprep.subr.mxu1 %v274_v7  ;;  %582 = vmatprep.subr.mxu0 %v549_v42  ;;  %v530_v7 = vunpack.c.l.bf16 %v492_v5  ;;  %v571_v42 = vunpack.c.h.bf16 %v512_v41 }
  0x7a   :  { %332 = vmatpush1.msra.mxu1 %v273_v8  ;;  %583 = vmatpush1.msra.mxu0 %v548_v43  ;;  %v491_v8 = vld [vmem:[#allocation8 + $0x28] sm:$0xff]  ;;  %v570_v43 = vunpack.c.l.bf16 %v512_v41 }
  0x7b   :  { %333 = vmatprep.subr.mxu1 %v272_v9  ;;  %584 = vmatprep.subr.mxu0 %v547_v45  ;;  %v529_v9 = vunpack.c.h.bf16 %v491_v8  ;;  %v569_v45 = vunpack.c.h.bf16 %v511_v44 }
  0x7c   :  { %334 = vmatpush1.msra.mxu1 %v271_v10  ;;  %585 = vmatpush1.msra.mxu0 %v546_v46  ;;  %v528_v10 = vunpack.c.l.bf16 %v491_v8  ;;  %v568_v46 = vunpack.c.l.bf16 %v511_v44 }
  0x7d   :  { %586 = vmatprep.subr.mxu0 %v545_v48  ;;  %v567_v48 = vunpack.c.h.bf16 %v510_v47 }
  0x7e   :  { %587 = vmatpush1.msra.mxu0 %v544_v49  ;;  %v566_v49 = vunpack.c.l.bf16 %v510_v47 }
  0x7f   :  { %588 = vmatprep.subr.mxu0 %v543_v51  ;;  %v565_v51 = vunpack.c.h.bf16 %v509_v50 }
  0x80   :  { %589 = vmatpush1.msra.mxu0 %v542_v52  ;;  %v564_v52 = vunpack.c.l.bf16 %v509_v50 }
  0x81   :  { %590 = vmatprep.subr.mxu0 %v541_v54  ;;  %v563_v54 = vunpack.c.h.bf16 %v508_v53 }
  0x82   :  { %591 = vmatpush1.msra.mxu0 %v540_v55  ;;  %v562_v55 = vunpack.c.l.bf16 %v508_v53  ;;  %v424_v53 = vlaneseq }
  0x83   :  { %592 = vmatprep.subr.mxu0 %v539_v57  ;;  %v506_v57 = vld [vmem:[#allocation8 + $0xa0] sm:$0xff] }
  0x84   :  { %593 = vmatpush1.msra.mxu0 %v538_v58  ;;  %v505_v58 = vld [vmem:[#allocation8 + $0x98] sm:$0xff]  ;;  %v558_v62 = vunpack.c.l.bf16 %v506_v57 }
  0x85   :  { %594 = vmatprep.subr.mxu0 %v537_v60  ;;  %v561_v60 = vunpack.c.h.bf16 %v507_v56  ;;  %v556_v2 = vunpack.c.l.bf16 %v505_v58 }
  0x86   :  { %595 = vmatpush1.msra.mxu0 %v536_v61  ;;  %v559_v61 = vunpack.c.h.bf16 %v506_v57 }
  0x87   :  { %596 = vmatprep.subr.mxu0 %v535_v63  ;;  %v504_v63 = vld [vmem:[#allocation8 + $0x90] sm:$0xff] }
  0x88   :  { %597 = vmatpush1.msra.mxu0 %v534_v1  ;;  %v557_v1 = vunpack.c.h.bf16 %v505_v58  ;;  %v554_v5 = vunpack.c.l.bf16 %v504_v63 }
  0x89   :  { %598 = vmatprep.subr.mxu0 %v533_v3  ;;  %v503_v3 = vld [vmem:[#allocation8 + $0x88] sm:$0xff] }
  0x8a   :  { %599 = vmatpush1.msra.mxu0 %v532_v4  ;;  %v555_v4 = vunpack.c.h.bf16 %v504_v63  ;;  %v552_v8 = vunpack.c.l.bf16 %v503_v3 }
  0x8b   :  { %600 = vmatprep.subr.mxu0 %v531_v6  ;;  %v502_v6 = vld [vmem:[#allocation8 + $0x80] sm:$0xff] }
  0x8c   :  { %601 = vmatpush1.msra.mxu0 %v530_v7  ;;  %v553_v7 = vunpack.c.h.bf16 %v503_v3 }
  0x8d   :  { %602 = vmatprep.subr.mxu0 %v529_v9  ;;  %v551_v9 = vunpack.c.h.bf16 %v502_v6 }
  0x8e   :  { %603 = vmatpush1.msra.mxu0 %v528_v10  ;;  %v550_v10 = vunpack.c.l.bf16 %v502_v6 }
 0x138   :  { %v222_v11 = vpop.f32.mrf.mxu0 }
 0x139   :  { %v226_v12 = vrot.slane %v222_v11, 4  ;;  %v234_v13 = vmul.f32 %v222_v11, %v222_v11 }
 0x13a   :  { %v1324_v14 = vpop.f32.mrf.mxu0 }
 0x13b   :  { %v227_v15 = vadd.f32 %v226_v12, %v222_v11  ;;  %v235_v16 = vrot.slane %v234_v13, 4  ;;  %v489_v14 = vld [vmem:[#allocation8 + $0x18] sm:$0xff] }
 0x13d   :  { %v228_v17 = vrot.slane %v227_v15, 2  ;;  %v236_v18 = vadd.f32 %v235_v16, %v234_v13  ;;  %v524_v16 = vunpack.c.l.bf16 %v489_v14 }
 0x13f   :  { %v229_v19 = vadd.f32 %v228_v17, %v227_v15  ;;  %v237_v20 = vrot.slane %v236_v18, 2  ;;  %v525_v15 = vunpack.c.h.bf16 %v489_v14  ;;  %v488_v17 = vld [vmem:[#allocation8 + $0x10] sm:$0xff] }
 0x141   :  { %v230_v21 = vrot.slane %v229_v19, 1  ;;  %v238_v22 = vadd.f32 %v237_v20, %v236_v18  ;;  %v523_v18 = vunpack.c.h.bf16 %v488_v17  ;;  %v487_v20 = vld [vmem:[#allocation8 + $0x8] sm:$0xff] }
 0x143   :  { %v231_v23 = vadd.f32 %v230_v21, %v229_v19  ;;  %v239_v24 = vrot.slane %v238_v22, 1  ;;  %v522_v19 = vunpack.c.l.bf16 %v488_v17  ;;  %v521_v21 = vunpack.c.h.bf16 %v487_v20 }
 0x145   :  { %v233_v25 = vmul.f32 0.125, %v231_v23  ;;  %v240_v26 = vadd.f32 %v239_v24, %v238_v22  ;;  %v520_v22 = vunpack.c.l.bf16 %v487_v20  ;;  %v486_v23 = vld [vmem:[#allocation8] sm:$0xff] }
 0x146   :  { %v519_v24 = vunpack.c.h.bf16 %v486_v23 }
 0x147   :  { %v241_v27 = vmul.f32 0.125, %v240_v26  ;;  %v242_v28 = vmul.f32 %v233_v25, %v233_v25  ;;  %v517_v26 = vld [vmem:[#allocation8 + $0xf8] sm:$0xff] }
 0x149   :  { %v243_v29 = vsub.f32 %v241_v27, %v242_v28  ;;  %v581_v27 = vunpack.c.h.bf16 %v517_v26  ;;  %v580_v28 = vunpack.c.l.bf16 %v517_v26 }
 0x14b   :  { %v244_v30 = vmax.f32 %v243_v29, 0.0  ;;  %v516_v29 = vld [vmem:[#allocation8 + $0xf0] sm:$0xff] }
 0x14d   :  { %v247_v31 = vadd.f32 1e-05, %v244_v30  ;;  %v579_v30 = vunpack.c.h.bf16 %v516_v29 }
 0x14f   :  { %1378 = vrsqrt.f32 %v247_v31  ;;  %v578_v31 = vunpack.c.l.bf16 %v516_v29 }
 0x15c   :  { %v1379_v33 = vpop.eup %1378 }
 0x15d   :  { %v249_v34 = vmul.f32 %v1379_v33, %v245_v32  ;;  %v515_v32 = vld [vmem:[#allocation8 + $0xe8] sm:$0xff] }
 0x15e   :  { %v577_v33 = vunpack.c.h.bf16 %v515_v32 }
 0x15f   :  { %v250_v36 = vmul.f32 %v249_v34, %v233_v25  ;;  %v252_v37 = vmul.f32 %v249_v34, %v222_v11  ;;  %v490_v11 = vld [vmem:[#allocation8 + $0x20] sm:$0xff]  ;;  %v518_v25 = vunpack.c.l.bf16 %v486_v23  ;;  %v576_v34 = vunpack.c.l.bf16 %v515_v32 }
 0x160   :  { %v527_v12 = vunpack.c.h.bf16 %v490_v11  ;;  %v526_v13 = vunpack.c.l.bf16 %v490_v11 }
 0x161   :  { %v251_v38 = vsub.f32 %v246_v35, %v250_v36  ;;  %v514_v35 = vld [vmem:[#allocation8 + $0xe0] sm:$0xff] }
 0x162   :  { %604 = vmatprep.subr.mxu0 %v527_v12  ;;  %v575_v36 = vunpack.c.h.bf16 %v514_v35 }
 0x163   :  { %v253_v39 = vadd.f32 %v252_v37, %v251_v38  ;;  %605 = vmatpush1.msra.mxu0 %v526_v13  ;;  %v574_v37 = vunpack.c.l.bf16 %v514_v35  ;;  %v513_v38 = vld [vmem:[#allocation8 + $0xd8] sm:$0xff] }
 0x164   :  { %606 = vmatprep.subr.mxu0 %v525_v15 }
 0x165   :  { %v254_v40 = vmax.f32 %v253_v39, 0.0  ;;  %607 = vmatpush1.msra.mxu0 %v524_v16  ;;  %v573_v39 = vunpack.c.h.bf16 %v513_v38 }
 0x166   :  { %608 = vmatprep.subr.mxu0 %v523_v18 }
 0x167   :  { %368 = vmatmul.mubr.f32.vlgmr.msra.gmra.mxu1 %v254_v40  ;;  %609 = vmatpush1.msra.mxu0 %v522_v19  ;;  %v572_v40 = vunpack.c.l.bf16 %v513_v38 }
 0x168   :  { %610 = vmatprep.subr.mxu0 %v521_v21 }
 0x169   :  { %611 = vmatpush1.msra.mxu0 %v520_v22 }
 0x16a   :  { %612 = vmatprep.subr.mxu0 %v519_v24 }
 0x16b   :  { %613 = vmatpush1.msra.mxu0 %v518_v25 }
 0x16c   :  { %614 = vmatprep.subr.mxu0 %v581_v27 }
 0x16d   :  { %615 = vmatpush2.msra.mxu0 %v580_v28 }
 0x16e   :  { %616 = vmatprep.subr.mxu0 %v579_v30 }
 0x16f   :  { %617 = vmatpush2.msra.mxu0 %v578_v31 }
 0x170   :  { %618 = vmatprep.subr.mxu0 %v577_v33 }
 0x171   :  { %619 = vmatpush2.msra.mxu0 %v576_v34 }
 0x172   :  { %620 = vmatprep.subr.mxu0 %v575_v36 }
 0x173   :  { %621 = vmatpush2.msra.mxu0 %v574_v37 }
 0x174   :  { %622 = vmatprep.subr.mxu0 %v573_v39 }
 0x175   :  { %623 = vmatpush2.msra.mxu0 %v572_v40 }
 0x176   :  { %624 = vmatprep.subr.mxu0 %v571_v42 }
 0x177   :  { %625 = vmatpush2.msra.mxu0 %v570_v43 }
 0x178   :  { %626 = vmatprep.subr.mxu0 %v569_v45 }
 0x179   :  { %627 = vmatpush2.msra.mxu0 %v568_v46 }
 0x17a   :  { %628 = vmatprep.subr.mxu0 %v567_v48 }
 0x17b   :  { %629 = vmatpush2.msra.mxu0 %v566_v49 }
 0x17c   :  { %630 = vmatprep.subr.mxu0 %v565_v51  ;;  %v1597_v51 = vmov 1966171168  }
 0x17d   :  { %631 = vmatpush2.msra.mxu0 %v564_v52  ;;  %v422_v52 = vunpack.c.l.s4 %v1597_v51 }
 0x17e   :  { %632 = vmatprep.subr.mxu0 %v563_v54 }
 0x17f   :  { %633 = vmatpush2.msra.mxu0 %v562_v55  ;;  %v423_v54 = vunpack.c.0.s8 %v422_v52  ;;  %v425_v55 = vshrl.u32 %v424_v53, 7  ;;  %v1200_v52 = vld [vmem:[#allocation10 + $0x10] sm:$0xff]  }
 0x180   :  { %634 = vmatprep.subr.mxu0 %v561_v60  ;;  %v1107_v53 = vunpack.c.h.bf16 %v1200_v52 }
 0x181   :  { %635 = vmatpush2.msra.mxu0 %v560_v59  ;;  %v1712_v57 = vsub.s32 %v423_v54, %v425_v55  ;;  %v1716_v63 = vsub.s32 0, %v425_v55 }
 0x182   :  { %636 = vmatprep.subr.mxu0 %v559_v61  ;;  %v411_v61 = vld [vmem:[#allocation13 + $0x2] ss:$8 sm:$0x3] }
 0x183   :  { %637 = vmatpush2.msra.mxu0 %v558_v62 }
 0x184   :  { %638 = vmatprep.subr.mxu0 %v557_v1  ;;  %v1718_v1 = vsub.s32 1, %v425_v55  ;;  %v1106_v55 = vunpack.c.l.bf16 %v1200_v52  ;;  %v690_v52 = vld [vmem:[#allocation13 + $0x4] ss:$8 sm:$0x3] }
 0x185   :  { %639 = vmatpush2.msra.mxu0 %v556_v2 }
 0x186   :  { %640 = vmatprep.subr.mxu0 %v555_v4 }
 0x187   :  { %641 = vmatpush2.msra.mxu0 %v554_v5 }
 0x188   :  { %642 = vmatprep.subr.mxu0 %v553_v7 }
 0x189   :  { %643 = vmatpush2.msra.mxu0 %v552_v8 }
 0x18a   :  { %644 = vmatprep.subr.mxu0 %v551_v9  ;;  %v413_v9 = vld [vmem:[#allocation13 + $0x3] ss:$8 sm:$0x3] }
 0x18b   :  { %645 = vmatpush2.msra.mxu0 %v550_v10 }
 0x227   :  { %v1700_v11 = vpop.f32.mrf.mxu1 }
 0x228   :  { %v374_v12 = vrot.slane %v1700_v11, 4  ;;  %v388_v13 = vmul.f32 %v1700_v11, %v1700_v11 }
 0x229   :  { %v1705_v14 = vpop.f32.mrf.mxu1 }
 0x22a   :  { %v375_v15 = vadd.f32 %v374_v12, %v1700_v11  ;;  %v390_v16 = vrot.slane %v388_v13, 4  ;;  %v380_v17 = vrot.slane %v1705_v14, 4  ;;  %v389_v18 = vmul.f32 %v1705_v14, %v1705_v14 }
 0x22c   :  { %v376_v19 = vrot.slane %v375_v15, 2  ;;  %v391_v20 = vadd.f32 %v390_v16, %v388_v13  ;;  %v381_v21 = vadd.f32 %v380_v17, %v1705_v14  ;;  %v396_v22 = vrot.slane %v389_v18, 4 }
 0x22e   :  { %v377_v23 = vadd.f32 %v376_v19, %v375_v15  ;;  %v392_v24 = vrot.slane %v391_v20, 2  ;;  %v382_v25 = vrot.slane %v381_v21, 2  ;;  %v397_v26 = vadd.f32 %v396_v22, %v389_v18  ;;  %v1213_v22 = vld [vmem:[#allocation10 + $0x78] sm:$0xff]  }
 0x230   :  { %v378_v27 = vrot.slane %v377_v23, 1  ;;  %v393_v28 = vadd.f32 %v392_v24, %v391_v20  ;;  %v383_v29 = vadd.f32 %v382_v25, %v381_v21  ;;  %v398_v30 = vrot.slane %v397_v26, 2  ;;  %v1205_v24 = vld [vmem:[#allocation10 + $0x38] sm:$0xff]  }
 0x231   :  { %v1127_v25 = vunpack.c.h.bf16 %v1205_v24 }
 0x232   :  { %v379_v31 = vadd.f32 %v378_v27, %v377_v23  ;;  %v394_v32 = vrot.slane %v393_v28, 1  ;;  %v384_v33 = vrot.slane %v383_v29, 1  ;;  %v399_v34 = vadd.f32 %v398_v30, %v397_v26  ;;  %v1212_v27 = vld [vmem:[#allocation10 + $0x70] sm:$0xff]  }
 0x233   :  { %v1159_v23 = vunpack.c.h.bf16 %v1213_v22  ;;  %v1158_v26 = vunpack.c.l.bf16 %v1213_v22  ;;  %v1154_v30 = vunpack.c.l.bf16 %v1212_v27 }
 0x234   :  { %v386_v35 = vmul.f32 0.125, %v379_v31  ;;  %v395_v36 = vadd.f32 %v394_v32, %v393_v28  ;;  %v385_v37 = vadd.f32 %v384_v33, %v383_v29  ;;  %v400_v38 = vrot.slane %v399_v34, 1  ;;  %v1211_v32 = vld [vmem:[#allocation10 + $0x68] sm:$0xff]  }
 0x235   :  { %1238 = vmatprep.subr.mxu1 %v1159_v23  ;;  %v1155_v28 = vunpack.c.h.bf16 %v1212_v27  ;;  %v1151_v33 = vunpack.c.h.bf16 %v1211_v32 }
 0x236   :  { %v402_v39 = vmul.f32 0.125, %v395_v36  ;;  %v404_v40 = vmul.f32 %v386_v35, %v386_v35  ;;  %v387_v41 = vmul.f32 0.125, %v385_v37  ;;  %v401_v42 = vadd.f32 %v400_v38, %v399_v34  ;;  %1239 = vmatpush3.msra.mxu1 %v1127_v25  ;;  %v1203_v34 = vld [vmem:[#allocation10 + $0x28] sm:$0xff]   ;;  %v1210_v38 = vld [vmem:[#allocation10 + $0x60] sm:$0xff]  }
 0x237   :  { %1240 = vmatprep.subr.mxu1 %v1158_v26  ;;  %v1150_v36 = vunpack.c.l.bf16 %v1211_v32  ;;  %v1118_v37 = vunpack.c.l.bf16 %v1203_v34 }
 0x238   :  { %v406_v43 = vsub.f32 %v402_v39, %v404_v40  ;;  %v403_v44 = vmul.f32 0.125, %v401_v42  ;;  %v405_v45 = vmul.f32 %v387_v41, %v387_v41  ;;  %v1147_v39 = vunpack.c.h.bf16 %v1210_v38  ;;  %v1202_v40 = vld [vmem:[#allocation10 + $0x20] sm:$0xff]  }
 0x239   :  { %v1146_v42 = vunpack.c.l.bf16 %v1210_v38 }
 0x23a   :  { %v408_v46 = vmax.f32 %v406_v43, 0.0  ;;  %v407_v47 = vsub.f32 %v403_v44, %v405_v45  ;;  %v1114_v43 = vunpack.c.l.bf16 %v1202_v40  ;;  %v1209_v44 = vld [vmem:[#allocation10 + $0x58] sm:$0xff]  }
 0x23b   :  { %v1143_v45 = vunpack.c.h.bf16 %v1209_v44 }
 0x23c   :  { %v414_v48 = vadd.f32 1e-05, %v408_v46  ;;  %v409_v49 = vmax.f32 %v407_v47, 0.0  ;;  %v1201_v46 = vld [vmem:[#allocation10 + $0x18] sm:$0xff]  }
 0x23d   :  { %v1111_v47 = vunpack.c.h.bf16 %v1201_v46 }
 0x23e   :  { %v415_v50 = vadd.f32 1e-05, %v409_v49  ;;  %1380 = vrsqrt.f32 %v414_v48  ;;  %v1142_v48 = vunpack.c.l.bf16 %v1209_v44  ;;  %v1110_v49 = vunpack.c.l.bf16 %v1201_v46 }
 0x240   :  { %1382 = vrsqrt.f32 %v415_v50  ;;  %v1208_v50 = vld [vmem:[#allocation10 + $0x50] sm:$0xff]  }
 0x241   :  { %v1139_v51 = vunpack.c.h.bf16 %v1208_v50  ;;  %v1138_v54 = vunpack.c.l.bf16 %v1208_v50 }
 0x24b   :  { %v1381_v56 = vpop.eup %1380 }
 0x24d   :  { %v1383_v58 = vpop.eup %1382 }
 0x24e   :  { %v420_v59 = vcombine.low %v1381_v56, %v1383_v58  ;;  %v1207_v56 = vld [vmem:[#allocation10 + $0x48] sm:$0xff]  }
 0x24f   :  { %v1199_v58 = vld [vmem:[#allocation10 + $0x8] sm:$0xff]  }
 0x250   :  { %v427_v60 = vrot.slane %v420_v59, %v1712_v57  ;;  %v1135_v59 = vunpack.c.h.bf16 %v1207_v56 }
 0x252   :  { %v434_v62 = vrot.slane %v427_v60, %v1712_v57  ;;  %v1103_v60 = vunpack.c.h.bf16 %v1199_v58 }
 0x254   :  { %v436_v2 = vmul.f32 %v434_v62, %v411_v61  ;;  %v1206_v61 = vld [vmem:[#allocation10 + $0x40] sm:$0xff]   ;;  %v1134_v62 = vunpack.c.l.bf16 %v1207_v56 }
 0x256   :  { %v441_v3 = vrot.slane %v436_v2, %v1716_v63  ;;  %v445_v4 = vrot.slane %v436_v2, %v1718_v1  ;;  %v1097_v2 = vld [vmem:[#allocation10] sm:$0xff]  }
 0x258   :  { %v448_v5 = vmul.f32 %v441_v3, %v386_v35  ;;  %v449_v6 = vmul.f32 %v445_v4, %v387_v41  ;;  %v470_v13 = vmul.f32 %v445_v4, %v1705_v14  ;;  %v469_v16 = vmul.f32 %v441_v3, %v1700_v11  ;;  %v1204_v11 = vld [vmem:[#allocation10 + $0x30] sm:$0xff]  }
 0x259   :  { %v1126_v14 = vunpack.c.l.bf16 %v1205_v24  ;;  %v1123_v29 = vunpack.c.h.bf16 %v1204_v11  ;;  %v1122_v31 = vunpack.c.l.bf16 %v1204_v11  ;;  %v1119_v35 = vunpack.c.h.bf16 %v1203_v34 }
 0x25a   :  { %v452_v7 = vcombine.low %v448_v5, %v449_v6  ;;  %v1115_v41 = vunpack.c.h.bf16 %v1202_v40  ;;  %v1102_v3 = vunpack.c.l.bf16 %v1199_v58  ;;  %v1131_v4 = vunpack.c.h.bf16 %v1206_v61 }
 0x25b   :  { %1241 = vmatpush3.msra.mxu1 %v1126_v14  ;;  %v1099_v5 = vunpack.c.h.bf16 %v1097_v2  ;;  %v1130_v6 = vunpack.c.l.bf16 %v1206_v61 }
 0x25c   :  { %v459_v8 = vrot.slane %v452_v7, %v1712_v57  ;;  %1242 = vmatprep.subr.mxu1 %v1155_v28  ;;  %v1098_v7 = vunpack.c.l.bf16 %v1097_v2 }
 0x25d   :  { %1243 = vmatpush3.msra.mxu1 %v1123_v29 }
 0x25e   :  { %v466_v10 = vrot.slane %v459_v8, %v1712_v57  ;;  %1244 = vmatprep.subr.mxu1 %v1154_v30 }
 0x25f   :  { %1245 = vmatpush3.msra.mxu1 %v1122_v31 }
 0x260   :  { %v468_v12 = vsub.f32 %v413_v9, %v466_v10  ;;  %1246 = vmatprep.subr.mxu1 %v1151_v33 }
 0x261   :  { %1247 = vmatpush3.msra.mxu1 %v1119_v35 }
 0x262   :  { %v479_v15 = vrot.slane %v468_v12, %v1718_v1  ;;  %v475_v17 = vrot.slane %v468_v12, %v1716_v63  ;;  %1248 = vmatprep.subr.mxu1 %v1150_v36 }
 0x263   :  { %1249 = vmatpush3.msra.mxu1 %v1118_v37 }
 0x264   :  { %v483_v18 = vadd.f32 %v479_v15, %v470_v13  ;;  %v482_v19 = vadd.f32 %v475_v17, %v469_v16  ;;  %1250 = vmatprep.subr.mxu1 %v1147_v39 }
 0x265   :  { %1251 = vmatpush3.msra.mxu1 %v1115_v41 }
 0x266   :  { %v485_v20 = vmax.f32 %v483_v18, 0.0  ;;  %v484_v21 = vmax.f32 %v482_v19, 0.0  ;;  %1252 = vmatprep.subr.mxu1 %v1146_v42 }
 0x267   :  { %1253 = vmatpush3.msra.mxu1 %v1114_v43 }
 0x268   :  { %646 = vmatprep.mubr.f32.mxu0 %v485_v20  ;;  %1254 = vmatprep.subr.mxu1 %v1143_v45 }
 0x269   :  { %647 = vmatmul.mubr.f32.vlgmr.msra.gmra.mxu0 %v484_v21  ;;  %1255 = vmatpush3.msra.mxu1 %v1111_v47 }
 0x26a   :  { %1256 = vmatprep.subr.mxu1 %v1142_v48 }
 0x26b   :  { %1257 = vmatpush3.msra.mxu1 %v1110_v49 }
 0x26c   :  { %1258 = vmatprep.subr.mxu1 %v1139_v51 }
 0x26d   :  { %1259 = vmatpush3.msra.mxu1 %v1107_v53 }
 0x26e   :  { %1260 = vmatprep.subr.mxu1 %v1138_v54 }
 0x26f   :  { %1261 = vmatpush3.msra.mxu1 %v1106_v55 }
 0x270   :  { %1262 = vmatprep.subr.mxu1 %v1135_v59 }
 0x271   :  { %1263 = vmatpush3.msra.mxu1 %v1103_v60 }
 0x272   :  { %1264 = vmatprep.subr.mxu1 %v1134_v62  ;;  %v692_v62 = vld [vmem:[#allocation13 + $0x5] ss:$8 sm:$0x3] }
 0x273   :  { %1265 = vmatpush3.msra.mxu1 %v1102_v3 }
 0x274   :  { %1266 = vmatprep.subr.mxu1 %v1131_v4 }
 0x275   :  { %1267 = vmatpush3.msra.mxu1 %v1099_v5 }
 0x276   :  { %1268 = vmatprep.subr.mxu1 %v1130_v6 }
 0x277   :  { %1269 = vmatpush3.msra.mxu1 %v1098_v7 }
 0x278   :  { %1325 = vmatprep.subr.mxu1 %v1595_v0 }
 0x329   :  { %v648_v8 = vpop.f32.mrf.mxu0 }
 0x32a   :  { %v653_v9 = vrot.slane %v648_v8, 4  ;;  %v667_v10 = vmul.f32 %v648_v8, %v648_v8 }
 0x32b   :  { %v650_v12 = vpop.f32.mrf.mxu0 }
 0x32c   :  { %v654_v13 = vadd.f32 %v653_v9, %v648_v8  ;;  %v669_v15 = vrot.slane %v667_v10, 4  ;;  %v659_v16 = vrot.slane %v650_v12, 4  ;;  %v668_v17 = vmul.f32 %v650_v12, %v650_v12 }
 0x32e   :  { %v655_v18 = vrot.slane %v654_v13, 2  ;;  %v670_v19 = vadd.f32 %v669_v15, %v667_v10  ;;  %v660_v20 = vadd.f32 %v659_v16, %v650_v12  ;;  %v675_v21 = vrot.slane %v668_v17, 4  ;;  %v1220_v16 = vld [vmem:[#allocation11 + $0x38] sm:$0xff]  }
 0x330   :  { %v656_v22 = vadd.f32 %v655_v18, %v654_v13  ;;  %v671_v23 = vrot.slane %v670_v19, 2  ;;  %v661_v24 = vrot.slane %v660_v20, 2  ;;  %v676_v25 = vadd.f32 %v675_v21, %v668_v17 }
 0x331   :  { %v1191_v17 = vunpack.c.h.bf16 %v1220_v16 }
 0x332   :  { %v657_v26 = vrot.slane %v656_v22, 1  ;;  %v672_v14 = vadd.f32 %v671_v23, %v670_v19  ;;  %v662_v27 = vadd.f32 %v661_v24, %v660_v20  ;;  %v677_v28 = vrot.slane %v676_v25, 2  ;;  %v1217_v20 = vld [vmem:[#allocation11 + $0x20] sm:$0xff]   ;;  %v1216_v23 = vld [vmem:[#allocation11 + $0x18] sm:$0xff]  }
 0x333   :  { %v1179_v21 = vunpack.c.h.bf16 %v1217_v20  ;;  %v1175_v24 = vunpack.c.h.bf16 %v1216_v23 }
 0x334   :  { %v658_v11 = vadd.f32 %v657_v26, %v656_v22  ;;  %v673_v29 = vrot.slane %v672_v14, 1  ;;  %v663_v30 = vrot.slane %v662_v27, 1  ;;  %v678_v31 = vadd.f32 %v677_v28, %v676_v25  ;;  %v1215_v26 = vld [vmem:[#allocation11 + $0x10] sm:$0xff]   ;;  %v1214_v28 = vld [vmem:[#allocation11 + $0x8] sm:$0xff]  }
 0x335   :  { %v1178_v22 = vunpack.c.l.bf16 %v1217_v20  ;;  %v1174_v25 = vunpack.c.l.bf16 %v1216_v23 }
 0x336   :  { %v665_v32 = vmul.f32 0.125, %v658_v11  ;;  %v674_v33 = vadd.f32 %v673_v29, %v672_v14  ;;  %v664_v34 = vadd.f32 %v663_v30, %v662_v27  ;;  %v679_v35 = vrot.slane %v678_v31, 1  ;;  %v1161_v30 = vld [vmem:[#allocation11] sm:$0xff]  }
 0x337   :  { %v1171_v14 = vunpack.c.h.bf16 %v1215_v26  ;;  %v1170_v27 = vunpack.c.l.bf16 %v1215_v26  ;;  %v1167_v11 = vunpack.c.h.bf16 %v1214_v28  ;;  %v1166_v29 = vunpack.c.l.bf16 %v1214_v28 }
 0x338   :  { %v681_v36 = vmul.f32 0.125, %v674_v33  ;;  %v683_v37 = vmul.f32 %v665_v32, %v665_v32  ;;  %v666_v38 = vmul.f32 0.125, %v664_v34  ;;  %v680_v39 = vadd.f32 %v679_v35, %v678_v31 }
 0x339   :  { %v1163_v31 = vunpack.c.h.bf16 %v1161_v30 }
 0x33a   :  { %v685_v40 = vsub.f32 %v681_v36, %v683_v37  ;;  %v682_v41 = vmul.f32 0.125, %v680_v39  ;;  %v684_v42 = vmul.f32 %v666_v38, %v666_v38 }
 0x33c   :  { %v687_v43 = vmax.f32 %v685_v40, 0.0  ;;  %v686_v44 = vsub.f32 %v682_v41, %v684_v42 }
 0x33e   :  { %v693_v45 = vadd.f32 1e-05, %v687_v43  ;;  %v688_v46 = vmax.f32 %v686_v44, 0.0 }
 0x340   :  { %v694_v47 = vadd.f32 1e-05, %v688_v46  ;;  %1384 = vrsqrt.f32 %v693_v45 }
 0x342   :  { %1386 = vrsqrt.f32 %v694_v47 }
 0x34d   :  { %v1385_v48 = vpop.eup %1384 }
 0x34f   :  { %v1387_v49 = vpop.eup %1386 }
 0x350   :  { %v699_v50 = vcombine.low %v1385_v48, %v1387_v49 }
 0x352   :  { %v706_v51 = vrot.slane %v699_v50, %v1712_v57 }
 0x354   :  { %v713_v53 = vrot.slane %v706_v51, %v1712_v57 }
 0x356   :  { %v715_v54 = vmul.f32 %v713_v53, %v690_v52 }
 0x358   :  { %v720_v55 = vrot.slane %v715_v54, %v1716_v63  ;;  %v724_v56 = vrot.slane %v715_v54, %v1718_v1  ;;  %v917_v54 = vld [vmem:[#allocation13 + $0x6] ss:$0 sm:$0xff] }
 0x35a   :  { %v727_v58 = vmul.f32 %v720_v55, %v665_v32  ;;  %v728_v59 = vmul.f32 %v724_v56, %v666_v38  ;;  %v749_v4 = vmul.f32 %v724_v56, %v650_v12  ;;  %v748_v6 = vmul.f32 %v720_v55, %v648_v8  ;;  %v1219_v12 = vld [vmem:[#allocation11 + $0x30] sm:$0xff]   ;;  %v1218_v8 = vld [vmem:[#allocation11 + $0x28] sm:$0xff]  }
 0x35b   :  { %v1183_v18 = vunpack.c.h.bf16 %v1218_v8  ;;  %v1182_v19 = vunpack.c.l.bf16 %v1218_v8  ;;  %v1162_v32 = vunpack.c.l.bf16 %v1161_v30 }
 0x35c   :  { %v731_v60 = vcombine.low %v727_v58, %v728_v59  ;;  %v918_v58 = vld [vmem:[#allocation13 + $0x7] ss:$0 sm:$0xff] }
 0x35e   :  { %v738_v61 = vrot.slane %v731_v60, %v1712_v57 }
 0x360   :  { %v745_v2 = vrot.slane %v738_v61, %v1712_v57  ;;  %v1190_v57 = vunpack.c.l.bf16 %v1220_v16 }
 0x362   :  { %v747_v3 = vsub.f32 %v692_v62, %v745_v2 }
 0x364   :  { %v758_v5 = vrot.slane %v747_v3, %v1718_v1  ;;  %v754_v7 = vrot.slane %v747_v3, %v1716_v63  ;;  %v1187_v1 = vunpack.c.h.bf16 %v1219_v12  ;;  %v1186_v63 = vunpack.c.l.bf16 %v1219_v12 }
 0x366   :  { %v762_v9 = vadd.f32 %v758_v5, %v749_v4  ;;  %v761_v10 = vadd.f32 %v754_v7, %v748_v6 }
 0x368   :  { %v764_v13 = vmax.f32 %v762_v9, 0.0  ;;  %v763_v15 = vmax.f32 %v761_v10, 0.0 }
 0x36a   :  { %893 = vmatprep.mubr.f32.mxu1 %v764_v13 }
 0x36b   :  { %894 = vmatmul.mubr.f32.vlgmr.msra.gmra.mxu1 %v763_v15 }
 0x36c   :  { %1357 = vmatprep.mubr.msk.f32.mxu1 %vm1596_vm0, %v1595_v0  ;;  %1326 = vmatpush3.msra.mxu1 %v1191_v17 }
 0x36d   :  { %1327 = vmatprep.subr.mxu1 %v1595_v0 }
 0x36e   :  { %1328 = vmatpush3.msra.mxu1 %v1190_v57 }
 0x36f   :  { %1329 = vmatprep.subr.mxu1 %v1595_v0 }
 0x370   :  { %1330 = vmatpush3.msra.mxu1 %v1187_v1 }
 0x371   :  { %1331 = vmatprep.subr.mxu1 %v1595_v0 }
 0x372   :  { %1332 = vmatpush3.msra.mxu1 %v1186_v63 }
 0x373   :  { %1333 = vmatprep.subr.mxu1 %v1595_v0 }
 0x374   :  { %1334 = vmatpush3.msra.mxu1 %v1183_v18 }
 0x375   :  { %1335 = vmatprep.subr.mxu1 %v1595_v0 }
 0x376   :  { %1336 = vmatpush3.msra.mxu1 %v1182_v19 }
 0x377   :  { %1337 = vmatprep.subr.mxu1 %v1595_v0 }
 0x378   :  { %1338 = vmatpush3.msra.mxu1 %v1179_v21 }
 0x379   :  { %1339 = vmatprep.subr.mxu1 %v1595_v0 }
 0x37a   :  { %1340 = vmatpush3.msra.mxu1 %v1178_v22 }
 0x37b   :  { %1341 = vmatprep.subr.mxu1 %v1595_v0 }
 0x37c   :  { %1342 = vmatpush3.msra.mxu1 %v1175_v24 }
 0x37d   :  { %1343 = vmatprep.subr.mxu1 %v1595_v0 }
 0x37e   :  { %1344 = vmatpush3.msra.mxu1 %v1174_v25 }
 0x37f   :  { %1345 = vmatprep.subr.mxu1 %v1595_v0 }
 0x380   :  { %1346 = vmatpush3.msra.mxu1 %v1171_v14 }
 0x381   :  { %1347 = vmatprep.subr.mxu1 %v1595_v0 }
 0x382   :  { %1348 = vmatpush3.msra.mxu1 %v1170_v27 }
 0x383   :  { %1349 = vmatprep.subr.mxu1 %v1595_v0 }
 0x384   :  { %1350 = vmatpush3.msra.mxu1 %v1167_v11 }
 0x385   :  { %1351 = vmatprep.subr.mxu1 %v1595_v0 }
 0x386   :  { %1352 = vmatpush3.msra.mxu1 %v1166_v29 }
 0x387   :  { %1353 = vmatprep.subr.mxu1 %v1595_v0 }
 0x388   :  { %1354 = vmatpush3.msra.mxu1 %v1163_v31 }
 0x389   :  { %1355 = vmatprep.subr.mxu1 %v1595_v0 }
 0x38a   :  { %1356 = vmatpush3.msra.mxu1 %v1162_v32 }
 0x42b   :  { %v1270_v33 = vpop.f32.mrf.mxu1 }
 0x42d   :  { %v1271_v34 = vpop.f32.mrf.mxu1 }
 0x42e   :  { %v1272_v35 = vadd.f32 %v1271_v34, %v1270_v33 }
 0x430   :  { %v899_v36 = vrot.slane %v1272_v35, 4  ;;  %v906_v37 = vmul.f32 %v1272_v35, %v1272_v35 }
 0x432   :  { %v900_v38 = vadd.f32 %v1272_v35, %v899_v36  ;;  %v907_v39 = vrot.slane %v906_v37, 4 }
 0x434   :  { %v901_v40 = vrot.slane %v900_v38, 2  ;;  %v908_v41 = vadd.f32 %v907_v39, %v906_v37 }
 0x436   :  { %v902_v42 = vadd.f32 %v901_v40, %v900_v38  ;;  %v909_v43 = vrot.slane %v908_v41, 2 }
 0x438   :  { %v903_v44 = vrot.slane %v902_v42, 1  ;;  %v910_v45 = vadd.f32 %v909_v43, %v908_v41 }
 0x43a   :  { %v904_v46 = vadd.f32 %v903_v44, %v902_v42  ;;  %v911_v47 = vrot.slane %v910_v45, 1 }
 0x43c   :  { %v905_v48 = vmul.f32 0.125, %v904_v46  ;;  %v912_v49 = vadd.f32 %v911_v47, %v910_v45 }
 0x43e   :  { %v913_v50 = vmul.f32 0.125, %v912_v49  ;;  %v914_v0 = vmul.f32 %v905_v48, %v905_v48 }
 0x440   :  { %v915_v51 = vsub.f32 %v913_v50, %v914_v0 }
 0x442   :  { %v916_v52 = vmax.f32 %v915_v51, 0.0 }
 0x444   :  { %v919_v53 = vadd.f32 1e-05, %v916_v52 }
 0x446   :  { %1388 = vrsqrt.f32 %v919_v53 }
 0x453   :  { %v1389_v55 = vpop.eup %1388 }
 0x454   :  { %v921_v56 = vmul.f32 %v1389_v55, %v917_v54 }
 0x456   :  { %v922_v59 = vmul.f32 %v921_v56, %v905_v48  ;;  %v924_v60 = vmul.f32 %v1272_v35, %v921_v56 }
 0x458   :  { %v923_v61 = vsub.f32 %v918_v58, %v922_v59 }
 0x45a   :  { %v925_v62 = vadd.f32 %v924_v60, %v923_v61 }
 0x45c   :  { %v926_v2 = vmax.f32 %v925_v62, 0.0 }
 0x45e   :  { %1358 = vmatmul.mubr.f32.vlgmr.msra.gmra.mxu1 %v926_v2  ;;  %927 = vst [vmem:[#allocation14] sm:$0xff] %v926_v2 }
 0x45f   :  { %1541 = shalt.err (!%p1538_p11)
}
 0x460   :  { %1041 = dma.vmem_to_hbm [thread:$0]  %s1039_s6, 128, %s1767_s7, [#allocation4]   ;;  %v960_v3 = vld [vmem:[#allocation13 + $0x10] ss:$0 sm:$0xff] }
 0x461   :  { %s1599_s21 = smov [#allocation15]  }
 0x462   :  { %s1048_s22 = sshll.u32 %s1599_s21, 4  ;;  %s1049_s22 = int_to_ptr.vmem [resolvable:$true] %s1048_s22 }
 0x463   :  { %s1550_s23 = scalar_lea.vmem %s1049_s22, 128  ;;  %p1555_p13 = scmp.lt.s32.totalorder %s1049_s22, %s1049_s22 }
 0x464   :  { %p1551_p12 = scmp.ne.s32.totalorder %s1049_s22, %s1550_s23  ;;  %p1556_p0 = scmp.lt.s32.totalorder %s1550_s23, %s1550_s23 }
 0x466   :  { %p1557_p1 = por %p1556_p0, %p1555_p13 }
 0x468   :  { %p1558_p2 = pnand %p1557_p1, %p1551_p12 }
 0x51e   :  { %v1027_v4 = vpop.f32.mrf.mxu1 }
 0x51f   :  { %v1028_v5 = vadd.f32 %v1027_v4, %v960_v3 }
 0x520   :  { %v1359_v6 = vpop.f32.mrf.mxu1 }
 0x521   :  { %1031 = vst [vmem:[#allocation15] sm:$0xff] %v1028_v5 }
 0x522   :  { %1561 = shalt.err (!%p1558_p2)
}
 0x523   :  { %1051 = dma.vmem_to_hbm [thread:$0]  %s1049_s22, 128, %s1768_s8, [#allocation16]  }
 0x524   :  { %1578 = dma.done.wait [#allocation4], 128  }
 0x525   :  { %1579 = vsyncadd [#allocation4], 4294967168 }
 0x526   :  { %1580 = dma.done.wait [#allocation16], 128  }
 0x527   :  { %1581 = vsyncadd [#allocation16], 4294967168 }
 0x528   :  { %1058 = vsyncpa [#allocation3], 1 }
 0x529   :  { %1059 = vsyncpa [#allocation6], 1 }
 0x52a   :  { %1060 = vsyncpa [#allocation9], 1 }
 0x52b   :  { %1061 = vsyncpa [#allocation12], 1 }
 0x52c   :  { %1062 = vsyncpa [#allocation4], 1 }
 0x52d   :  { %1063 = vsyncpa [#allocation16], 1 }

</bundles_post_ra>
